<compile_context>
chip_gen: v7x
topology: tpu7x:2x2x1
jax: 0.10.0
libtpu: 0.0.40
codegen_flags: <defaults>
</compile_context>

<pallas_src>
import functools
import math

import jax
import jax.numpy as jnp
from jax import lax
from jax.experimental import pallas as pl
from jax.experimental.pallas import tpu as pltpu

LANES = 128
SUBLANES = 8
TARGET_TILE_ROWS = 2048   # 2048x128 f32 = 1 MiB per input per pipeline buffer
NCORES = 2                # v7x megacore split; serial (and harmless) on v5e/v6e


def _round_up(x, m):
    return ((x + m - 1) // m) * m


def _iou_counts_kernel(sr_ref, gt_ref, out_ref, acc_sum_ref, acc_int_ref,
                       *, blocks_per_core, rows_total, sr_threshold,
                       gt_threshold):
    """Per-core partial sums of [|SR>t|+|GT>t|, intersection] as (8,128) slabs."""
    c = pl.program_id(0)   # "parallel" core-split axis
    i = pl.program_id(1)   # "arbitrary" accumulation axis

    @pl.when(i == 0)
    def _init():
        acc_sum_ref[...] = jnp.zeros_like(acc_sum_ref)
        acc_int_ref[...] = jnp.zeros_like(acc_int_ref)

    tile_rows, lanes = sr_ref.shape

    # Row-level validity: phantom blocks (clamped by the index_map onto the
    # last real block) and the out-of-range rows of a partial last block must
    # not contribute.  The ragged <128-element tail inside the last valid row
    # was padded with -inf by the wrapper, so no lane-level masking is needed.
    base_row = (c * blocks_per_core + i) * tile_rows
    row_idx = lax.broadcasted_iota(jnp.int32, (tile_rows, lanes), 0)
    valid = row_idx < (rows_total - base_row)

    sp = (sr_ref[...] > sr_threshold) & valid   # sigmoid(SR) > t  <=>  SR > logit(t)
    gp = (gt_ref[...] > gt_threshold) & valid

    f_sp = sp.astype(jnp.float32)
    f_gp = gp.astype(jnp.float32)

    def fold(x):
        # (tile_rows, 128) -> (8, 128): vreg-aligned adds over groups of 8
        # consecutive rows (pure VPU, no cross-lane movement).
        return x.reshape(-1, SUBLANES, lanes).sum(axis=0)

    acc_sum_ref[...] += fold(f_sp + f_gp)    # |SR>t| + |GT>t|
    acc_int_ref[...] += fold(f_sp * f_gp)    # intersection

    @pl.when(i == pl.num_programs(1) - 1)
    def _finalize():
        out_ref[0, 0] = acc_sum_ref[...]
        out_ref[0, 1] = acc_int_ref[...]


def iou_loss(SR, GT, threshold, smooth=1e-12):
    """JAX/Pallas equivalent of IoULoss(threshold).forward(SR, GT, smooth)."""
    sr_flat = SR.reshape(-1).astype(jnp.float32)
    gt_flat = GT.reshape(-1).astype(jnp.float32)
    n = sr_flat.shape[0]
    if n == 0:
        return jnp.float32(1.0)

    # Pad only the ragged (<128 element) tail so data views as (rows, 128).
    # -inf never exceeds any threshold, so padded lanes contribute nothing.
    rem = n % LANES
    if rem:
        pad = LANES - rem
        sr_flat = jnp.pad(sr_flat, (0, pad), constant_values=-jnp.inf)
        gt_flat = jnp.pad(gt_flat, (0, pad), constant_values=-jnp.inf)
    rows = sr_flat.shape[0] // LANES
    sr2 = sr_flat.reshape(rows, LANES)
    gt2 = gt_flat.reshape(rows, LANES)

    tile_rows = min(TARGET_TILE_ROWS, _round_up(rows, SUBLANES))
    blocks_total = pl.cdiv(rows, tile_rows)
    bpc = pl.cdiv(blocks_total, NCORES)          # blocks per core (>= 1)

    # sigmoid(x) > t  <=>  x > log(t / (1 - t)); skip the EUP sigmoid entirely.
    t = float(threshold)
    if t <= 0.0:
        sr_threshold = -float("inf")
    elif t >= 1.0:
        sr_threshold = float("inf")
    else:
        sr_threshold = math.log(t / (1.0 - t))

    kernel = functools.partial(
        _iou_counts_kernel,
        blocks_per_core=bpc,
        rows_total=rows,
        sr_threshold=sr_threshold,
        gt_threshold=t,
    )

    def in_map(c, i):
        # Clamp phantom blocks (when blocks_total is not a multiple of NCORES)
        # onto the last real block; the in-kernel row mask zeroes their
        # contribution, so the loaded data is never double counted.
        return (jnp.minimum(c * bpc + i, blocks_total - 1), 0)

    partials = pl.pallas_call(
        kernel,
        out_shape=jax.ShapeDtypeStruct((NCORES, 2, SUBLANES, LANES), jnp.float32),
        grid_spec=pltpu.PrefetchScalarGridSpec(
            num_scalar_prefetch=0,
            grid=(NCORES, bpc),
            in_specs=[
                pl.BlockSpec((tile_rows, LANES), in_map),
                pl.BlockSpec((tile_rows, LANES), in_map),
            ],
            out_specs=pl.BlockSpec((1, 2, SUBLANES, LANES),
                                   lambda c, i: (c, 0, 0, 0)),
            scratch_shapes=[
                pltpu.VMEM((SUBLANES, LANES), jnp.float32),  # |SR>t| + |GT>t|
                pltpu.VMEM((SUBLANES, LANES), jnp.float32),  # intersection
            ],
        ),
        compiler_params=pltpu.CompilerParams(
            dimension_semantics=("parallel", "arbitrary"),
        ),
    )(sr2, gt2)

    counts = jnp.sum(partials, axis=(0, 2, 3))   # [sum_sr + sum_gt, inter]
    inter = counts[1]
    union = counts[0] - inter
    return 1.0 - inter / (union + smooth)


def iou_loss_ref(SR, GT, threshold, smooth=1e-12):
    """Pure-JAX reference mirroring the PyTorch forward."""
    sr = jax.nn.sigmoid(SR.astype(jnp.float32)).reshape(-1)
    gt = GT.astype(jnp.float32).reshape(-1)
    inter = jnp.sum((sr > threshold) & (gt > threshold)).astype(jnp.float32)
    union = (
        jnp.sum(sr > threshold).astype(jnp.float32)
        + jnp.sum(gt > threshold).astype(jnp.float32)
        - inter
    )
    return 1.0 - inter / (union + smooth)


if __name__ == "__main__":
    threshold = 0.5
    key = jax.random.PRNGKey(0)
    k_sr, k_gt, k_sr2, k_gt2 = jax.random.split(key, 4)

    # NCHW-shaped logits (SR) and binary ground truth (GT), as the module expects.
    SR = jax.random.normal(k_sr, (2, 4, 16, 16), dtype=jnp.float32)
    GT = jax.random.bernoulli(k_gt, p=0.5, shape=(2, 4, 16, 16)).astype(jnp.float32)

    loss = jax.block_until_ready(iou_loss(SR, GT, threshold))
    ref = jax.block_until_ready(iou_loss_ref(SR, GT, threshold))
    assert abs(float(loss) - float(ref)) < 1e-6, (float(loss), float(ref))

    # Ragged case (element count not a multiple of 128) exercises the -inf
    # tail padding and phantom-block masking paths.
    SRr = jax.random.normal(k_sr2, (2, 4, 11, 11), dtype=jnp.float32)
    GTr = jax.random.bernoulli(k_gt2, p=0.5, shape=(2, 4, 11, 11)).astype(jnp.float32)
    loss_r = jax.block_until_ready(iou_loss(SRr, GTr, threshold))
    ref_r = jax.block_until_ready(iou_loss_ref(SRr, GTr, threshold))
    assert abs(float(loss_r) - float(ref_r)) < 1e-6, (float(loss_r), float(ref_r))

    print("KERNEL_OK")
</pallas_src>

<mosaic_0001>
module attributes {stable_mosaic.version = 11 : i64} {
  func.func @_iou_counts_kernel(%arg0: i32, %arg1: i32, %arg2: memref<16x128xf32, #tpu.memory_space<vmem>>, %arg3: memref<16x128xf32, #tpu.memory_space<vmem>>, %arg4: memref<1x2x8x128xf32, #tpu.memory_space<vmem>>, %arg5: memref<8x128xf32, #tpu.memory_space<vmem>>, %arg6: memref<8x128xf32, #tpu.memory_space<vmem>>) attributes {dimension_semantics = [#tpu.dimension_semantics<parallel>, #tpu.dimension_semantics<arbitrary>], iteration_bounds = array<i64: 2, 1>, scalar_prefetch = 0 : i64, scratch_operands = 2 : i64, tpu.core_type = #tpu.core_type<tc>, window_params = [{transform_indices = @transform_0, window_bounds = array<i64: 16, 128>}, {transform_indices = @transform_1, window_bounds = array<i64: 16, 128>}, {transform_indices = @transform_2, window_bounds = array<i64: 1, 2, 8, 128>}]} {
    %c0_i32 = arith.constant 0 : i32
    %0 = arith.cmpi eq, %arg1, %c0_i32 : i32
    %1 = arith.extui %0 : i1 to i32
    %c0_i32_0 = arith.constant 0 : i32
    %2 = arith.cmpi ne, %1, %c0_i32_0 : i32
    scf.if %2 {
      %cst_18 = arith.constant 0.000000e+00 : f32
      %37 = vector.broadcast %cst_18 : f32 to vector<8x128xf32>
      %c0_19 = arith.constant 0 : index
      %c0_20 = arith.constant 0 : index
      %38 = vector.load %arg5[%c0_19, %c0_20] : memref<8x128xf32, #tpu.memory_space<vmem>>, vector<8x128xf32>
      tpu.vector_store %arg5[%c0_19, %c0_20], %37 {strides = array<i32>} : memref<8x128xf32, #tpu.memory_space<vmem>>, vector<8x128xf32>,
      %cst_21 = arith.constant 0.000000e+00 : f32
      %39 = vector.broadcast %cst_21 : f32 to vector<8x128xf32>
      %c0_22 = arith.constant 0 : index
      %c0_23 = arith.constant 0 : index
      %40 = vector.load %arg6[%c0_22, %c0_23] : memref<8x128xf32, #tpu.memory_space<vmem>>, vector<8x128xf32>
      tpu.vector_store %arg6[%c0_22, %c0_23], %39 {strides = array<i32>} : memref<8x128xf32, #tpu.memory_space<vmem>>, vector<8x128xf32>,
    } else {
    }
    %c1_i32 = arith.constant 1 : i32
    %3 = arith.muli %arg0, %c1_i32 : i32
    %4 = arith.addi %3, %arg1 : i32
    %c16_i32 = arith.constant 16 : i32
    %5 = arith.muli %4, %c16_i32 : i32
    %6 = tpu.iota {dimensions = array<i32: 0>} : vector<16x128xi32>
    %c16_i32_1 = arith.constant 16 : i32
    %7 = arith.subi %c16_i32_1, %5 : i32
    %8 = vector.broadcast %7 : i32 to vector<16x128xi32>
    %9 = arith.cmpi slt, %6, %8 : vector<16x128xi32>
    %c0 = arith.constant 0 : index
    %c0_2 = arith.constant 0 : index
    %10 = vector.load %arg2[%c0, %c0_2] : memref<16x128xf32, #tpu.memory_space<vmem>>, vector<16x128xf32>
    %cst = arith.constant 0.000000e+00 : f32
    %11 = vector.broadcast %cst : f32 to vector<16x128xf32>
    %12 = arith.cmpf ogt, %10, %11 : vector<16x128xf32>
    %13 = arith.andi %12, %9 : vector<16x128xi1>
    %c0_3 = arith.constant 0 : index
    %c0_4 = arith.constant 0 : index
    %14 = vector.load %arg3[%c0_3, %c0_4] : memref<16x128xf32, #tpu.memory_space<vmem>>, vector<16x128xf32>
    %cst_5 = arith.constant 5.000000e-01 : f32
    %15 = vector.broadcast %cst_5 : f32 to vector<16x128xf32>
    %16 = arith.cmpf ogt, %14, %15 : vector<16x128xf32>
    %17 = arith.andi %16, %9 : vector<16x128xi1>
    %18 = arith.extui %13 : vector<16x128xi1> to vector<16x128xi32>
    %19 = arith.sitofp %18 : vector<16x128xi32> to vector<16x128xf32>
    %20 = arith.extui %17 : vector<16x128xi1> to vector<16x128xi32>
    %21 = arith.sitofp %20 : vector<16x128xi32> to vector<16x128xf32>
    %c0_6 = arith.constant 0 : index
    %c0_7 = arith.constant 0 : index
    %22 = vector.load %arg5[%c0_6, %c0_7] : memref<8x128xf32, #tpu.memory_space<vmem>>, vector<8x128xf32>
    %23 = arith.addf %19, %21 : vector<16x128xf32>
    %24 = vector.shape_cast %23 : vector<16x128xf32> to vector<2x8x128xf32>
    %cst_8 = arith.constant dense<0.000000e+00> : vector<8x128xf32>
    %25 = vector.multi_reduction <add>, %24, %cst_8 [0] : vector<2x8x128xf32> to vector<8x128xf32>
    %26 = arith.addf %22, %25 : vector<8x128xf32>
    %c0_9 = arith.constant 0 : index
    %c0_10 = arith.constant 0 : index
    %27 = vector.load %arg5[%c0_9, %c0_10] : memref<8x128xf32, #tpu.memory_space<vmem>>, vector<8x128xf32>
    tpu.vector_store %arg5[%c0_9, %c0_10], %26 {strides = array<i32>} : memref<8x128xf32, #tpu.memory_space<vmem>>, vector<8x128xf32>,
    %c0_11 = arith.constant 0 : index
    %c0_12 = arith.constant 0 : index
    %28 = vector.load %arg6[%c0_11, %c0_12] : memref<8x128xf32, #tpu.memory_space<vmem>>, vector<8x128xf32>
    %29 = arith.mulf %19, %21 : vector<16x128xf32>
    %30 = vector.shape_cast %29 : vector<16x128xf32> to vector<2x8x128xf32>
    %cst_13 = arith.constant dense<0.000000e+00> : vector<8x128xf32>
    %31 = vector.multi_reduction <add>, %30, %cst_13 [0] : vector<2x8x128xf32> to vector<8x128xf32>
    %32 = arith.addf %28, %31 : vector<8x128xf32>
    %c0_14 = arith.constant 0 : index
    %c0_15 = arith.constant 0 : index
    %33 = vector.load %arg6[%c0_14, %c0_15] : memref<8x128xf32, #tpu.memory_space<vmem>>, vector<8x128xf32>
    tpu.vector_store %arg6[%c0_14, %c0_15], %32 {strides = array<i32>} : memref<8x128xf32, #tpu.memory_space<vmem>>, vector<8x128xf32>,
    %c0_i32_16 = arith.constant 0 : i32
    %34 = arith.cmpi eq, %arg1, %c0_i32_16 : i32
    %35 = arith.extui %34 : i1 to i32
    %c0_i32_17 = arith.constant 0 : i32
    %36 = arith.cmpi ne, %35, %c0_i32_17 : i32
    scf.if %36 {
      %c0_18 = arith.constant 0 : index
      %c0_19 = arith.constant 0 : index
      %37 = vector.load %arg5[%c0_18, %c0_19] : memref<8x128xf32, #tpu.memory_space<vmem>>, vector<8x128xf32>
      %c0_20 = arith.constant 0 : index
      %c0_21 = arith.constant 0 : index
      %c0_22 = arith.constant 0 : index
      %c0_23 = arith.constant 0 : index
      %38 = vector.load %arg4[%c0_20, %c0_21, %c0_22, %c0_23] : memref<1x2x8x128xf32, #tpu.memory_space<vmem>>, vector<1x1x8x128xf32>
      %39 = vector.shape_cast %38 : vector<1x1x8x128xf32> to vector<8x128xf32>
      %40 = vector.shape_cast %37 : vector<8x128xf32> to vector<1x1x8x128xf32>
      tpu.vector_store %arg4[%c0_20, %c0_21, %c0_22, %c0_23], %40 {strides = array<i32>} : memref<1x2x8x128xf32, #tpu.memory_space<vmem>>, vector<1x1x8x128xf32>,
      %c0_24 = arith.constant 0 : index
      %c0_25 = arith.constant 0 : index
      %41 = vector.load %arg6[%c0_24, %c0_25] : memref<8x128xf32, #tpu.memory_space<vmem>>, vector<8x128xf32>
      %c0_26 = arith.constant 0 : index
      %c1 = arith.constant 1 : index
      %c0_27 = arith.constant 0 : index
      %c0_28 = arith.constant 0 : index
      %42 = vector.load %arg4[%c0_26, %c1, %c0_27, %c0_28] : memref<1x2x8x128xf32, #tpu.memory_space<vmem>>, vector<1x1x8x128xf32>
      %43 = vector.shape_cast %42 : vector<1x1x8x128xf32> to vector<8x128xf32>
      %44 = vector.shape_cast %41 : vector<8x128xf32> to vector<1x1x8x128xf32>
      tpu.vector_store %arg4[%c0_26, %c1, %c0_27, %c0_28], %44 {strides = array<i32>} : memref<1x2x8x128xf32, #tpu.memory_space<vmem>>, vector<1x1x8x128xf32>,
    } else {
    }
    return
  }
  func.func @transform_0(%arg0: i32, %arg1: i32) -> (i32, i32) {
    %c1_i32 = arith.constant 1 : i32
    %0 = arith.muli %arg0, %c1_i32 : i32
    %1 = arith.addi %0, %arg1 : i32
    %c0_i32 = arith.constant 0 : i32
    %2 = arith.minsi %1, %c0_i32 : i32
    %c0_i32_0 = arith.constant 0 : i32
    %c0_i32_1 = arith.constant 0 : i32
    return %2, %c0_i32_0 : i32, i32
  }
  func.func @transform_1(%arg0: i32, %arg1: i32) -> (i32, i32) {
    %c1_i32 = arith.constant 1 : i32
    %0 = arith.muli %arg0, %c1_i32 : i32
    %1 = arith.addi %0, %arg1 : i32
    %c0_i32 = arith.constant 0 : i32
    %2 = arith.minsi %1, %c0_i32 : i32
    %c0_i32_0 = arith.constant 0 : i32
    %c0_i32_1 = arith.constant 0 : i32
    return %2, %c0_i32_0 : i32, i32
  }
  func.func @transform_2(%arg0: i32, %arg1: i32) -> (i32, i32, i32, i32) {
    %c0_i32 = arith.constant 0 : i32
    %c0_i32_0 = arith.constant 0 : i32
    %c0_i32_1 = arith.constant 0 : i32
    %c0_i32_2 = arith.constant 0 : i32
    return %arg0, %c0_i32, %c0_i32_0, %c0_i32_1 : i32, i32, i32, i32
  }
}

</mosaic_0001>

<bundles_post_ra>
// kernel: tpu_custom_call.1
= control target key start
LH: loop header
LB: loop body
LE: loop exit
PB: predicated region body
PF: predicated region fallthrough
CT: control target
= control target key end

     0   :  { %7 = vsyncpa [#allocation5], 0  ;;  %s948_s0 = inlined_call_operand.hbm [shape: f32[16,128], index: 0, kind: input, shape index: {}]   ;;  %s949_s1 = inlined_call_operand.hbm [shape: f32[16,128], index: 1, kind: input, shape index: {}]   ;;  %s950_s2 = inlined_call_operand.hbm [shape: f32[2,2,8,128], index: 2, kind: output, shape index: {}]  }
   0x1   :  { %9 = vsyncpa [#allocation5 + $0x1], 0 }
   0x2   :  { %10 = vsyncpa [#allocation8], 0 }
   0x3   :  { %12 = vsyncpa [#allocation8 + $0x1], 0 }
   0x4   :  { %13 = vsyncpa [#allocation6], 0 }
   0x5   :  { %15 = vsyncpa [#allocation6 + $0x1], 0  ;;  %s729_s9 = smov 0   ;;  %s731_s10 = smov 0  }
   0x6   :  { %s733_s11 = smov 0   ;;  %s735_s12 = smov 0  }
   0x7   :  { %s737_s13 = smov 0   ;;  %s739_s14 = smov 0  }
   0x8   :  { %s741_s15 = smov 0   ;;  %s743_s16 = smov 0  }
   0x9 LB: > { %s413_s17 = sadd.s32 4294967295, %s704_s16   ;;  %s414_s18 = sadd.s32 4294967294, %s704_s16   ;;  %s704_s16 = sphi %s743_s16, %s21_s16   ;;  %s700_s15 = sphi %s741_s15, %s971_s15   ;;  %s696_s14 = sphi %s739_s14, %s970_s14   ;;  %s692_s13 = sphi %s737_s13, %s938_s13   ;;  %s688_s12 = sphi %s735_s12, %s969_s12   ;;  %s684_s11 = sphi %s733_s11, %s968_s11   ;;  %s680_s10 = sphi %s731_s10, %s967_s10   ;;  %s676_s9 = sphi %s729_s9, %s966_s9  }
   0xa   : > { %s33_s19 = sadd.s32 1, %s700_s15  ;;  %p673_p1 = scmp.ne.s32.totalorder %s692_s13, 0 }
   0xb   : > { %p35_p0 = scmp.ge.s32.totalorder %s33_s19, 2  ;;  %p54_p2 = scmp.eq.s32.totalorder %s704_s16, 0 }
   0xc   : > { %p59_p3 = scmp.ne.s32.totalorder %s692_s13, %s688_s12  ;;  %p60_p5 = scmp.eq.s32.totalorder %s413_s17, 0 }
   0xd   : > { %s973_s19 = smov (%p35_p0, %s33_s19), 0  ;;  %p775_p4 = por %p673_p1, %p54_p2 }
   0xe   : > { %p779_p6 = por %p60_p5, %p59_p3  ;;  %s101_s22 = ssub.s32 %s700_s15, %s973_s19 }
   0xf   : > { %p102_p7 = scmp.eq.s32.totalorder %s101_s22, 0  ;;  %s104_s23 = sadd.s32 1, %s684_s11 }
  0x10   : > { %s954_s21 = scalar_select %p779_p6, 1, 0 }
  0x11   : > { %s787_s24 = scalar_select %p102_p7, %s684_s11, %s104_s23  }
  0x12   : > { %p114_p8 = scmp.ne.s32.totalorder %s684_s11, %s680_s10  ;;  %p115_p9 = scmp.eq.s32.totalorder %s413_s17, 1 }
  0x13   : > { %p120_p10 = scmp.ne.s32.totalorder %s680_s10, %s676_s9  ;;  %p121_p11 = scmp.eq.s32.totalorder %s414_s18, 1 }
  0x14   : > { %p793_p12 = por %p115_p9, %p114_p8  ;;  %p458_p1 = scmp.lt.s32.totalorder %s704_s16, 2 }
  0x15   : > { %p798_p0 = por %p121_p11, %p120_p10  ;;  %s706_s27 = smov [#allocation4]  }
  0x16   : > { %s955_s25 = scalar_select %p793_p12, 1, 0 }
  0x17   : > { %s956_s26 = scalar_select %p798_p0, 1, 0 }
  0x18   : > { %s155_s28 = sshll.u32 %s706_s27, 4  ;;  %p805_p2 = pnand %p458_p1, %p775_p4  ;;  %s156_s28 = int_to_ptr.vmem [resolvable:$true] %s155_s28 }
  0x19   : > { %s537_s4 = scalar_lea.hbm %s948_s0, 256 }
  0x1a   : > { %p538_p3 = scmp.ne.s32.totalorder %s948_s0, %s537_s4  ;;  %p539_p5 = pneg %p805_p2 }
  0x1b   : > { %p544_p8 = scmp.lt.u32.totalorder %s537_s4, %s537_s4  ;;  %p546_p9 = scmp.lt.u32.totalorder %s537_s4, %s948_s0 }
  0x1c   : > { %p540_p7 = pnand %p539_p5, %p538_p3 }
  0x1d   : > { %p547_p10 = por %p546_p9, %p544_p8 }
  0x1e   : > { %p541_p4 = pneg %p540_p7 }
  0x20   : > { %p548_p11 = pnand %p547_p10, %p541_p4 }
  0x22   : > { %551 = shalt.err (!%p548_p11)
}
  0x23   : > { %s552_s12 = scalar_lea.vmem %s156_s28, 256  ;;  %s559_s17 = scalar_lea.vmem %s156_s28, 512 }
  0x24   : > { %p553_p1 = scmp.ne.s32.totalorder %s156_s28, %s552_s12  ;;  %p560_p12 = scmp.lt.s32.totalorder %s156_s28, %s156_s28 }
  0x25   : > { %p561_p6 = scmp.lt.s32.totalorder %s559_s17, %s552_s12 }
  0x26   : > { %p555_p13 = pnand %p553_p1, %p539_p5 }
  0x27   : > { %p562_p3 = por %p561_p6, %p560_p12 }
  0x28   : > { %p556_p0 = pneg %p555_p13 }
  0x2a   : > { %p563_p7 = pnand %p562_p3, %p556_p0 }
  0x2c   : > { %566 = shalt.err (!%p563_p7)
}
  0x2d   : > { %s707_s18 = smov 128   ;;  %s708_s20 = smov 8  }
  0x2e   : > { %450 = dma.hbm_to_vmem [thread:$0]  (!%p805_p2), %s948_s0, 256, %s156_s28, [#allocation5], %s707_s18, %s707_s18, %s708_s20  }
  0x2f   : > { %p423_p13 = scmp.ge.s32.totalorder %s704_s16, 1  ;;  %p187_p4 = scmp.lt.s32.totalorder %s704_s16, 3 }
  0x30   : > { %s709_s30 = smov [#allocation7]   ;;  %s567_s6 = scalar_lea.hbm %s949_s1, 256 }
  0x31   : > { %p836_p8 = pnand %p423_p13, %p187_p4  ;;  %s179_s3 = sshll.u32 %s709_s30, 4  ;;  %s180_s3 = int_to_ptr.vmem [resolvable:$true] %s179_s3 }
  0x32   : > { %p568_p6 = scmp.ne.s32.totalorder %s949_s1, %s567_s6  ;;  %p574_p9 = scmp.lt.u32.totalorder %s567_s6, %s567_s6 }
  0x33   : > { %s958_s27 = scalar_select %p836_p8, 1, 0 }
  0x34   : > { %p570_p12 = pnand %p568_p6, %p539_p5  ;;  %p576_p10 = scmp.lt.u32.totalorder %s567_s6, %s949_s1 }
  0x36   : > { %p571_p0 = pneg %p570_p12  ;;  %p577_p11 = por %p576_p10, %p574_p9 }
  0x38   : > { %p578_p1 = pnand %p577_p11, %p571_p0 }
  0x3a   : > { %581 = shalt.err (!%p578_p1)
}
  0x3b   : > { %s582_s17 = scalar_lea.vmem %s180_s3, 256  ;;  %s589_s22 = scalar_lea.vmem %s180_s3, 512 }
  0x3c   : > { %p583_p3 = scmp.ne.s32.totalorder %s180_s3, %s582_s17  ;;  %p590_p4 = scmp.lt.s32.totalorder %s180_s3, %s180_s3 }
  0x3d   : > { %p591_p8 = scmp.lt.s32.totalorder %s589_s22, %s582_s17 }
  0x3e   : > { %p585_p7 = pnand %p583_p3, %p539_p5 }
  0x3f   : > { %p592_p6 = por %p591_p8, %p590_p4 }
  0x40   : > { %p586_p13 = pneg %p585_p7 }
  0x42   : > { %p593_p12 = pnand %p592_p6, %p586_p13 }
  0x44   : > { %596 = shalt.err (!%p593_p12)
}
  0x45   : > { %453 = dma.hbm_to_vmem [thread:$0]  (!%p805_p2), %s949_s1, 256, %s180_s3, [#allocation8], %s707_s18, %s707_s18, %s708_s20  }
  0x46   : > { %p959_p0 = scmp.ne.s32.totalorder %s958_s27, 0 }
  0x47   : > { %s193_s4 = sand.u32 (!%p959_p0), 1, %s692_s13   ;;  %p960_p5 = scmp.ne.s32.totalorder (!%p959_p0), %s954_s21, 0 }
  0x48   : > { %191 = sbr.rel (%p959_p0) target bundleno = 111 (0x6f), region = 28  ;;  %s424_s5 = sshll.u32 (!%p959_p0), %s193_s4, 4 }
  0x49   : > { %s194_s6 = scalar_lea.sflag (!%p959_p0), [#allocation5], %s193_s4  ;;  %s197_s7 = scalar_lea.vmem (!%p959_p0), [#allocation4], %s424_s5 }
  0x4f   : > { %662 = dma.done.wait (%p960_p5), %s194_s6, 256  }
  0x50   : > { %664 = vsyncadd (%p960_p5), %s194_s6, 4294967040  ;;  %s203_s29 = scalar_lea.sflag [#allocation8], %s193_s4  ;;  %s206_s8 = scalar_lea.vmem [#allocation7], %s424_s5 }
  0x51   : > { %666 = dma.done.wait (%p960_p5), %s203_s29, 256  }
  0x52   : > { %668 = vsyncadd (%p960_p5), %s203_s29, 4294967040  ;;  %s427_s18 = sshll.u32 %s696_s14, 4  ;;  %v248_v0 = vlaneseq  ;;  %s229_s27 = sand.u32 1, %s680_s10   ;;  %v255_v5 = vld [vmem:[%s197_s7] sm:$0xff]  ;;  %v256_v6 = vld [vmem:[%s197_s7 + $0x8] sm:$0xff]  ;;  %v710_v9 = vmov 0.0  }
  0x53   : > { %s251_s20 = ssub.s32 16, %s427_s18  ;;  %s426_s3 = sshll.u32 %s229_s27, 4  ;;  %v261_v7 = vld [vmem:[%s206_s8] sm:$0xff]  ;;  %vm257_vm2 = vcmp.gt.f32.partialorder %v255_v5, 0.0  ;;  %vm258_vm3 = vcmp.gt.f32.partialorder %v256_v6, 0.0  ;;  %v262_v8 = vld [vmem:[%s206_s8 + $0x8] sm:$0xff] }
  0x54   : > { %v249_v1 = vshrl.u32 %v248_v0, 7  ;;  %v252_v2 = vstv %s251_s20  ;;  %vm263_vm4 = vcmp.gt.f32.partialorder %v261_v7, 0.5  ;;  %vm264_vm6 = vcmp.gt.f32.partialorder %v262_v8, 0.5  ;;  %s231_s21 = scalar_lea.vmem [#allocation9], %s426_s3  ;;  %s440_s12 = sshll.u32 %s696_s14, 8 }
  0x55   : > { %s309_s28 = sshll.u32 %s231_s21, 4  ;;  %s892_s23 = scalar_lea.hbm %s950_s2, %s440_s12  ;;  %s887_s28 = int_to_ptr.vmem [resolvable:$true] %s309_s28 }
  0x56   : > { %v250_v3 = vadd.s32 8, %v249_v1  ;;  %vm253_vm0 = vcmp.lt.s32.totalorder %v249_v1, %v252_v2  ;;  %s896_s14 = scalar_lea.sflag [#allocation6], %s229_s27  ;;  %s597_s30 = scalar_lea.vmem %s887_s28, 256 }
  0x57   : > { %vm259_vm5 = vmand %vm257_vm2, %vm253_vm0  ;;  %p598_p2 = scmp.ne.s32.totalorder %s887_s28, %s597_s30  ;;  %p963_p8 = scmp.ne.s32.totalorder %s955_s25, 0 }
  0x58   : > { %vm878_vm1 = vcmp.lt.s32.totalorder %v250_v3, %v252_v2  ;;  %v428_v10 = vsel %vm259_vm5, 1.0, %v710_v9  ;;  %vm265_vm8 = vmand %vm263_vm4, %vm253_vm0  ;;  %s711_s4 = smov [#allocation9]  }
  0x59   : > { %vm260_vm7 = vmand %vm258_vm3, %vm878_vm1  ;;  %v430_v12 = vsel %vm265_vm8, 1.0, %v710_v9  ;;  %p599_p9 = pnand %p598_p2, %p963_p8  ;;  %s601_s5 = sshll.u32 %s711_s4, 4  ;;  %s602_s5 = int_to_ptr.vmem [resolvable:$false] %s601_s5 }
  0x5a   : > { %v429_v11 = vsel %vm260_vm7, 1.0, %v710_v9  ;;  %vm266_vm9 = vmand %vm264_vm6, %vm878_vm1  ;;  %v276_v14 = vadd.f32 %v430_v12, %v428_v10  ;;  %v282_v15 = vmul.f32 %v430_v12, %v428_v10  ;;  %s603_s6 = scalar_lea.vmem %s602_s5, 512  ;;  %p604_p11 = scmp.lt.s32.totalorder %s887_s28, %s602_s5 }
  0x5b   : > { %v431_v13 = vsel %vm266_vm9, 1.0, %v710_v9  ;;  %p600_p10 = pneg %p599_p9  ;;  %p605_p1 = scmp.lt.s32.totalorder %s603_s6, %s597_s30 }
  0x5c   : > { %v277_v16 = vadd.f32 %v431_v13, %v429_v11  ;;  %v283_v17 = vmul.f32 %v431_v13, %v429_v11 }
  0x5d   : > { %p606_p3 = por %p605_p1, %p604_p11 }
  0x5e   : > { %v278_v18 = vadd.f32 %v277_v16, %v276_v14  ;;  %v284_v19 = vadd.f32 %v283_v17, %v282_v15 }
  0x5f   : > { %p607_p7 = pnand %p606_p3, %p600_p10 }
  0x60   : > { %291 = vst [vmem:[%s231_s21] sm:$0xff] %v278_v18  ;;  %432 = vst [vmem:[%s231_s21 + $0x8] sm:$0xff] %v284_v19 }
  0x61   : > { %610 = shalt.err (!%p607_p7)
}
  0x62   : > { %s611_s7 = scalar_lea.hbm %s892_s23, 256  ;;  %s615_s18 = scalar_lea.hbm %s950_s2, 512 }
  0x63   : > { %p612_p13 = scmp.ne.s32.totalorder %s892_s23, %s611_s7  ;;  %p616_p12 = scmp.lt.u32.totalorder %s892_s23, %s950_s2 }
  0x64   : > { %p617_p0 = scmp.lt.u32.totalorder %s615_s18, %s611_s7  ;;  %p619_p2 = scmp.lt.u32.totalorder %s611_s7, %s892_s23 }
  0x65   : > { %p613_p4 = pnand %p612_p13, %p963_p8 }
  0x66   : > { %p618_p5 = por %p617_p0, %p616_p12 }
  0x67   : > { %p614_p6 = pneg %p613_p4 }
  0x68   : > { %p620_p9 = por %p619_p2, %p618_p5 }
  0x6a   : > { %p621_p10 = pnand %p620_p9, %p614_p6 }
  0x6c   : > { %624 = shalt.err (!%p621_p10)
}
  0x6d   : > { %s712_s3 = smov 128   ;;  %s713_s21 = smov 8  }
  0x6e   : > { %445 = dma.vmem_to_hbm [thread:$0]  (%p963_p8), %s887_s28, 256, %s892_s23, %s896_s14, %s712_s3, %s712_s3, %s713_s21  }
  0x6f PF: > { %s324_s12 = sand.u32 1, %s676_s9   ;;  %p964_p11 = scmp.ne.s32.totalorder %s956_s26, 0 }
  0x70   : > { %p965_p1 = scmp.ge.s32.totalorder %s704_s16, 2  ;;  %s325_s17 = scalar_lea.sflag [#allocation6], %s324_s12 }
  0x72   : > { %p455_p3 = pnand %p965_p1, %p964_p11 }
  0x74   : > { %670 = dma.done.wait (!%p455_p3), %s325_s17, 256  }
  0x75   : > { %672 = vsyncadd (!%p455_p3), %s325_s17, 4294967040  ;;  %s21_s16 = sadd.s32 1, %s704_s16   ;;  %s966_s9 = smov %s680_s10 }
  0x76   : > { %p18_p7 = scmp.ge.s32.totalorder %s21_s16, 4   ;;  %s967_s10 = smov %s684_s11 }
  0x77   : > { %s968_s11 = smov %s787_s24  ;;  %s969_s12 = smov %s692_s13 }
  0x78   : > { %s938_s13 = smov 0   ;;  %s970_s14 = smov %s700_s15 }
  0x79   : > { %s971_s15 = smov %s973_s19  ;;  %20 = sbr.rel (!%p18_p7) target bundleno = 9 (0x9), region = 95 }
  0x80   :  { %330 = vsyncpa [#allocation5], 1 }
  0x81   :  { %332 = vsyncpa [#allocation5 + $0x1], 1 }
  0x82   :  { %333 = vsyncpa [#allocation8], 1 }
  0x83   :  { %335 = vsyncpa [#allocation8 + $0x1], 1 }
  0x84   :  { %336 = vsyncpa [#allocation6], 1 }
  0x85   :  { %338 = vsyncpa [#allocation6 + $0x1], 1 }

</bundles_post_ra>
